<compile_context>
chip_gen: v7x
topology: tpu7x:2x2x1
jax: 0.10.0
libtpu: 0.0.40
codegen_flags: <defaults>
</compile_context>

<pallas_src>
import functools

import numpy as np
import jax
import jax.numpy as jnp
from jax.experimental import pallas as pl
from jax.experimental.pallas import tpu as pltpu


def _atten_one_kernel(*args, block_q, self_attn, approx_recip):
    if self_attn:
        ctx_ref, wq_ref, wkv_ref, wo_ref, o_ref, kt_s, v_s = args
    else:
        x_ref, ctx_ref, wq_ref, wkv_ref, wo_ref, o_ref, kt_s, v_s = args

    qi = pl.program_id(1)
    cdt = ctx_ref.dtype
    bb, m, dc = ctx_ref.shape
    inner = wq_ref.shape[1]

    # K/V projection depends only on the batch block: compute it once per batch block
    # (first query tile) into VMEM scratch and reuse for every later query tile.
    # NOTE: this is why the qi grid axis must remain sequential ("arbitrary").
    @pl.when(qi == 0)
    def _():
        ctx2 = ctx_ref[...].reshape(bb * m, dc)      # zero-copy: m % sublane pack == 0
        kv = jnp.dot(ctx2, wkv_ref[...], preferred_element_type=jnp.float32)
        k = kv[:, :inner].reshape(bb, m, inner)      # lane split, aligned if inner%128==0
        v = kv[:, inner:].reshape(bb, m, inner)
        # Store K transposed once per batch block (simple per-b 2-D transposes) so the
        # per-tile scoring matmul needs no K transpose.
        for b in range(bb):
            kt_s[b] = jnp.swapaxes(k[b], 0, 1).astype(kt_s.dtype)
        v_s[...] = v.astype(v_s.dtype)

    # Query tile: for self-attention it is sliced out of the resident ctx block (no
    # extra x DMA); for cross-attention it comes from its own (bb, block_q, Dq) block.
    if self_attn:
        dq = dc
        if block_q == m:
            x_blk = ctx_ref[...]
        else:
            q_start = pl.multiple_of(qi * block_q, block_q)
            x_blk = ctx_ref[:, pl.ds(q_start, block_q), :]
    else:
        dq = x_ref.shape[-1]
        x_blk = x_ref[...]

    x2 = x_blk.reshape(bb * block_q, dq)
    # Softmax scale is pre-folded into Wq on the host.
    q = jnp.dot(x2, wq_ref[...], preferred_element_type=jnp.float32)
    q = q.astype(cdt).reshape(bb, block_q, inner)

    sim = jnp.einsum('bqd,bdk->bqk', q, kt_s[...],
                     preferred_element_type=jnp.float32)
    sim = sim - jnp.max(sim, axis=-1, keepdims=True)
    p = jnp.exp(sim)
    inv_l = pl.reciprocal(jnp.sum(p, axis=-1, keepdims=True), approx=approx_recip)
    attn = (p * inv_l).astype(cdt)

    out = jnp.einsum('bqk,bkd->bqd', attn, v_s[...],
                     preferred_element_type=jnp.float32)
    y = jnp.dot(out.astype(cdt).reshape(bb * block_q, inner), wo_ref[...],
                preferred_element_type=jnp.float32)
    o_ref[...] = y.reshape(bb, block_q, dq).astype(o_ref.dtype)


def _sublane_pack(dtype):
    return {4: 8, 2: 16, 1: 32}[jnp.dtype(dtype).itemsize]


def atten_one_forward(x, params, context=None, *, block_b=None, block_q=None,
                      compute_dtype=None, approx_reciprocal=False,
                      vmem_budget_bytes=24 * 1024 * 1024):
    """JAX/Pallas equivalent of AttenOne.forward.

    params = (wq, wkv, wo), the PyTorch weights transposed to (in, out):
      wq  = to_q.weight.T   (Dq, inner)
      wkv = to_kv.weight.T  (Dc, 2*inner)   # fused K|V, chunked along the last dim
      wo  = to_out.weight.T (inner, Dq)
    """
    wq, wkv, wo = params
    B, N, Dq = x.shape
    inner = wq.shape[1]
    out_dtype = x.dtype

    self_attn = context is None
    ctx = x if self_attn else context           # context = default(context, x)
    _, M, Dc = ctx.shape
    assert ctx.shape[0] == B
    assert wq.shape == (Dq, inner)
    assert wkv.shape == (Dc, 2 * inner)
    assert wo.shape == (inner, Dq)

    # Fold the 1/sqrt(inner) softmax scale into Wq (weight-only host op).
    scale = float(inner) ** -0.5
    wq = wq * scale

    # bf16 inputs halve HBM/DMA traffic on every generation (incl. v5e, whose MXU runs
    # bf16 at full rate); accumulation and the softmax stay f32 inside the kernel.
    if compute_dtype is not None:
        x = x.astype(compute_dtype)
        ctx = ctx.astype(compute_dtype)
        wq, wkv, wo = (w.astype(compute_dtype) for w in (wq, wkv, wo))
    cdt = ctx.dtype
    pack = _sublane_pack(cdt)
    itemsize = jnp.dtype(cdt).itemsize

    if block_q is None:
        block_q = N
        for cand in (512, 256, 128):
            if N > cand and N % cand == 0:
                block_q = cand
                break
    if block_b is None:
        # Resident VMEM per batch block: ctx double-buffer (2x) + K^T/V scratch (2x)
        # plus the f32 logits working set (sim + p). Cap at B//2 so the parallel batch
        # axis has >=2 steps (both v7x TensorCores busy).
        def footprint(bb):
            resident = 4 * bb * M * max(Dc, inner) * itemsize
            logits = 2 * bb * block_q * M * 4
            return resident + logits
        cap = max(1, B // 2)
        block_b = 1
        for cand in (8, 4, 2):
            if cand <= cap and B % cand == 0 and footprint(cand) <= vmem_budget_bytes:
                block_b = cand
                break

    assert B % block_b == 0, "block_b must divide the batch size"
    assert N % block_q == 0, "block_q must divide the query length"
    assert block_q % pack == 0 and M % pack == 0, (
        "block_q and the context length must be multiples of the sublane pack "
        f"({pack} for {cdt}) so in-kernel reshapes stay zero-copy")
    # NOTE: inner % 128 == 0 keeps the fused K|V lane split aligned (true for any
    # query_dim that is a multiple of 128); other sizes are correct but slower.

    kernel = functools.partial(_atten_one_kernel, block_q=block_q,
                               self_attn=self_attn, approx_recip=approx_reciprocal)
    grid = (B // block_b, N // block_q)

    ctx_spec = pl.BlockSpec((block_b, M, Dc), lambda b, qi: (b, 0, 0))
    w_specs = [
        pl.BlockSpec((Dq, inner), lambda b, qi: (0, 0)),       # Wq (scale folded in)
        pl.BlockSpec((Dc, 2 * inner), lambda b, qi: (0, 0)),   # Wkv fused
        pl.BlockSpec((inner, Dq), lambda b, qi: (0, 0)),       # Wo
    ]
    if self_attn:
        in_specs = [ctx_spec] + w_specs                         # no separate x DMA
        operands = (ctx, wq, wkv, wo)
    else:
        x_spec = pl.BlockSpec((block_b, block_q, Dq), lambda b, qi: (b, qi, 0))
        in_specs = [x_spec, ctx_spec] + w_specs
        operands = (x, ctx, wq, wkv, wo)

    return pl.pallas_call(
        kernel,
        out_shape=jax.ShapeDtypeStruct((B, N, Dq), out_dtype),
        grid_spec=pltpu.PrefetchScalarGridSpec(
            num_scalar_prefetch=0,
            grid=grid,
            in_specs=in_specs,
            out_specs=pl.BlockSpec((block_b, block_q, Dq), lambda b, qi: (b, qi, 0)),
            scratch_shapes=[
                pltpu.VMEM((block_b, inner, M), cdt),   # K^T cache (pre-transposed)
                pltpu.VMEM((block_b, M, inner), cdt),   # V cache
            ],
        ),
        compiler_params=pltpu.CompilerParams(
            # qi axis must stay "arbitrary": later query tiles read scratch from qi==0.
            dimension_semantics=("parallel", "arbitrary"),
            vmem_limit_bytes=48 * 1024 * 1024,
        ),
    )(*operands)


def atten_one_reference(x, params, context=None):
    """Pure-JAX reference matching the PyTorch forward (for verification)."""
    wq, wkv, wo = params
    ctx = x if context is None else context
    inner = wq.shape[1]
    scale = float(inner) ** -0.5
    q = x @ wq
    kv = ctx @ wkv
    k, v = kv[..., :inner], kv[..., inner:]
    sim = jnp.einsum('bid,bjd->bij', q, k) * scale
    attn = jax.nn.softmax(sim, axis=-1)
    out = jnp.einsum('bij,bjd->bid', attn, v)
    return out @ wo


def init_params(key, query_dim):
    """Synthetic AttenOne weights (Linear, bias=False), stored as (in, out), i.e.
    wq = to_q.weight.T, wkv = to_kv.weight.T (fused K|V), wo = to_out.weight.T."""
    inner = query_dim
    ks = jax.random.split(key, 3)
    s = 1.0 / np.sqrt(query_dim)
    wq = jax.random.normal(ks[0], (query_dim, inner), jnp.float32) * s
    wkv = jax.random.normal(ks[1], (query_dim, 2 * inner), jnp.float32) * s
    wo = jax.random.normal(ks[2], (inner, query_dim), jnp.float32) * s
    return wq, wkv, wo


if __name__ == "__main__":
    key = jax.random.PRNGKey(0)
    k_x, k_p, k_c, k_x2 = jax.random.split(key, 4)

    B, N, query_dim = 4, 16, 128          # lane-dense output (Dq = 128)
    x = jax.random.normal(k_x, (B, N, query_dim), jnp.float32)
    params = init_params(k_p, query_dim)

    # 1) Self-attention (context=None): x is never DMA'd separately; queries are
    #    sliced out of the resident ctx block. f32 compute, exact reciprocal.
    #    Tolerances allow for TPU default matmul precision.
    out = jax.block_until_ready(atten_one_forward(x, params, block_b=2))
    ref = atten_one_reference(x, params)
    assert out.shape == (B, N, query_dim)
    np.testing.assert_allclose(np.asarray(out), np.asarray(ref), rtol=5e-3, atol=5e-3)

    # 2) Cross-attention with an explicit context of a different length.
    M = 32
    ctxt = jax.random.normal(k_c, (B, M, query_dim), jnp.float32)
    out_c = jax.block_until_ready(atten_one_forward(x, params, context=ctxt, block_b=2))
    ref_c = atten_one_reference(x, params, context=ctxt)
    np.testing.assert_allclose(np.asarray(out_c), np.asarray(ref_c), rtol=5e-3, atol=5e-3)

    # 3) bf16 MXU inputs + query tiling + approx reciprocal + default (VMEM-budgeted,
    #    parallel-axis-capped) block_b.
    B2, N2 = 2, 256
    x2 = jax.random.normal(k_x2, (B2, N2, query_dim), jnp.float32)
    out_b = jax.block_until_ready(
        atten_one_forward(x2, params, block_q=128,
                          compute_dtype=jnp.bfloat16, approx_reciprocal=True))
    ref_b = atten_one_reference(x2, params)
    np.testing.assert_allclose(np.asarray(out_b), np.asarray(ref_b), rtol=3e-2, atol=3e-2)

    print("KERNEL_OK")
</pallas_src>

<mosaic_0001>
module attributes {stable_mosaic.version = 11 : i64} {
  func.func @_atten_one_kernel(%arg0: i32, %arg1: i32, %arg2: memref<2x16x128xf32, #tpu.memory_space<vmem>>, %arg3: memref<128x128xf32, #tpu.memory_space<vmem>>, %arg4: memref<128x256xf32, #tpu.memory_space<vmem>>, %arg5: memref<128x128xf32, #tpu.memory_space<vmem>>, %arg6: memref<2x16x128xf32, #tpu.memory_space<vmem>>, %arg7: memref<2x128x16xf32, #tpu.memory_space<vmem>>, %arg8: memref<2x16x128xf32, #tpu.memory_space<vmem>>) attributes {dimension_semantics = [#tpu.dimension_semantics<parallel>, #tpu.dimension_semantics<arbitrary>], iteration_bounds = array<i64: 2, 1>, scalar_prefetch = 0 : i64, scratch_operands = 2 : i64, tpu.core_type = #tpu.core_type<tc>, window_params = [{transform_indices = @transform_0, window_bounds = array<i64: 2, 16, 128>}, {pipeline_mode = #tpu.pipeline_mode<synchronous>, transform_indices = @transform_1, window_bounds = array<i64: 128, 128>}, {pipeline_mode = #tpu.pipeline_mode<synchronous>, transform_indices = @transform_2, window_bounds = array<i64: 128, 256>}, {pipeline_mode = #tpu.pipeline_mode<synchronous>, transform_indices = @transform_3, window_bounds = array<i64: 128, 128>}, {transform_indices = @transform_4, window_bounds = array<i64: 2, 16, 128>}]} {
    %c0_i32 = arith.constant 0 : i32
    %0 = arith.cmpi eq, %arg1, %c0_i32 : i32
    %1 = arith.extui %0 : i1 to i32
    %c0_i32_0 = arith.constant 0 : i32
    %2 = arith.cmpi ne, %1, %c0_i32_0 : i32
    scf.if %2 {
      %c0_21 = arith.constant 0 : index
      %c0_22 = arith.constant 0 : index
      %c0_23 = arith.constant 0 : index
      %27 = vector.load %arg2[%c0_21, %c0_22, %c0_23] : memref<2x16x128xf32, #tpu.memory_space<vmem>>, vector<2x16x128xf32>
      %28 = vector.shape_cast %27 : vector<2x16x128xf32> to vector<32x128xf32>
      %c0_24 = arith.constant 0 : index
      %c0_25 = arith.constant 0 : index
      %29 = vector.load %arg4[%c0_24, %c0_25] : memref<128x256xf32, #tpu.memory_space<vmem>>, vector<128x256xf32>
      %cst_26 = arith.constant dense<0.000000e+00> : vector<32x256xf32>
      %30 = tpu.matmul %28, %29, %cst_26 {dimension_numbers = #tpu.dot_dimension_numbers<[1], [0], [0], [1], [0, 0, 1, 1], [], []>} : vector<32x128xf32>, vector<128x256xf32>, vector<32x256xf32> -> vector<32x256xf32>
      %31 = vector.extract_strided_slice %30 {offsets = [0, 0], sizes = [32, 128], strides = [1, 1]} : vector<32x256xf32> to vector<32x128xf32>
      %32 = vector.shape_cast %31 : vector<32x128xf32> to vector<2x16x128xf32>
      %33 = vector.extract_strided_slice %30 {offsets = [0, 128], sizes = [32, 128], strides = [1, 1]} : vector<32x256xf32> to vector<32x128xf32>
      %34 = vector.shape_cast %33 : vector<32x128xf32> to vector<2x16x128xf32>
      %35 = vector.extract_strided_slice %32 {offsets = [0, 0, 0], sizes = [1, 16, 128], strides = [1, 1, 1]} : vector<2x16x128xf32> to vector<1x16x128xf32>
      %36 = vector.shape_cast %35 : vector<1x16x128xf32> to vector<16x128xf32>
      %37 = tpu.transpose %36, [1, 0] : vector<16x128xf32> -> vector<128x16xf32>
      %c0_27 = arith.constant 0 : index
      %c0_28 = arith.constant 0 : index
      %c0_29 = arith.constant 0 : index
      %38 = vector.load %arg7[%c0_27, %c0_28, %c0_29] : memref<2x128x16xf32, #tpu.memory_space<vmem>>, vector<1x128x16xf32>
      %39 = vector.shape_cast %38 : vector<1x128x16xf32> to vector<128x16xf32>
      %40 = vector.shape_cast %37 : vector<128x16xf32> to vector<1x128x16xf32>
      tpu.vector_store %arg7[%c0_27, %c0_28, %c0_29], %40 {strides = array<i32>} : memref<2x128x16xf32, #tpu.memory_space<vmem>>, vector<1x128x16xf32>,
      %41 = vector.extract_strided_slice %32 {offsets = [1, 0, 0], sizes = [1, 16, 128], strides = [1, 1, 1]} : vector<2x16x128xf32> to vector<1x16x128xf32>
      %42 = vector.shape_cast %41 : vector<1x16x128xf32> to vector<16x128xf32>
      %43 = tpu.transpose %42, [1, 0] : vector<16x128xf32> -> vector<128x16xf32>
      %c1 = arith.constant 1 : index
      %c0_30 = arith.constant 0 : index
      %c0_31 = arith.constant 0 : index
      %44 = vector.load %arg7[%c1, %c0_30, %c0_31] : memref<2x128x16xf32, #tpu.memory_space<vmem>>, vector<1x128x16xf32>
      %45 = vector.shape_cast %44 : vector<1x128x16xf32> to vector<128x16xf32>
      %46 = vector.shape_cast %43 : vector<128x16xf32> to vector<1x128x16xf32>
      tpu.vector_store %arg7[%c1, %c0_30, %c0_31], %46 {strides = array<i32>} : memref<2x128x16xf32, #tpu.memory_space<vmem>>, vector<1x128x16xf32>,
      %c0_32 = arith.constant 0 : index
      %c0_33 = arith.constant 0 : index
      %c0_34 = arith.constant 0 : index
      %47 = vector.load %arg8[%c0_32, %c0_33, %c0_34] : memref<2x16x128xf32, #tpu.memory_space<vmem>>, vector<2x16x128xf32>
      tpu.vector_store %arg8[%c0_32, %c0_33, %c0_34], %34 {strides = array<i32>} : memref<2x16x128xf32, #tpu.memory_space<vmem>>, vector<2x16x128xf32>,
    } else {
    }
    %c0 = arith.constant 0 : index
    %c0_1 = arith.constant 0 : index
    %c0_2 = arith.constant 0 : index
    %3 = vector.load %arg2[%c0, %c0_1, %c0_2] : memref<2x16x128xf32, #tpu.memory_space<vmem>>, vector<2x16x128xf32>
    %4 = vector.shape_cast %3 : vector<2x16x128xf32> to vector<32x128xf32>
    %c0_3 = arith.constant 0 : index
    %c0_4 = arith.constant 0 : index
    %5 = vector.load %arg3[%c0_3, %c0_4] : memref<128x128xf32, #tpu.memory_space<vmem>>, vector<128x128xf32>
    %cst = arith.constant dense<0.000000e+00> : vector<32x128xf32>
    %6 = tpu.matmul %4, %5, %cst {dimension_numbers = #tpu.dot_dimension_numbers<[1], [0], [0], [1], [0, 0, 1, 1], [], []>} : vector<32x128xf32>, vector<128x128xf32>, vector<32x128xf32> -> vector<32x128xf32>
    %7 = vector.shape_cast %6 : vector<32x128xf32> to vector<2x16x128xf32>
    %c0_5 = arith.constant 0 : index
    %c0_6 = arith.constant 0 : index
    %c0_7 = arith.constant 0 : index
    %8 = vector.load %arg7[%c0_5, %c0_6, %c0_7] : memref<2x128x16xf32, #tpu.memory_space<vmem>>, vector<2x128x16xf32>
    "tpu.trace_start"() <{level = 10 : i32, message = "bqd,bdk->bqk"}> : () -> ()
    %cst_8 = arith.constant dense<0.000000e+00> : vector<2x16x16xf32>
    %9 = tpu.matmul %7, %8, %cst_8 {dimension_numbers = #tpu.dot_dimension_numbers<[2], [1], [1], [2], [0, 0, 0, 1, 1, 2], [0], [0]>} : vector<2x16x128xf32>, vector<2x128x16xf32>, vector<2x16x16xf32> -> vector<2x16x16xf32>
    "tpu.trace_stop"() : () -> ()
    %cst_9 = arith.constant dense<0xFF800000> : vector<2x16xf32>
    %10 = vector.multi_reduction <maximumf>, %9, %cst_9 [2] : vector<2x16x16xf32> to vector<2x16xf32>
    %11 = vector.shape_cast %10 : vector<2x16xf32> to vector<2x16x1xf32>
    %12 = vector.broadcast %11 : vector<2x16x1xf32> to vector<2x16x16xf32>
    %13 = arith.subf %9, %12 : vector<2x16x16xf32>
    %14 = math.exp %13 : vector<2x16x16xf32>
    %cst_10 = arith.constant dense<0.000000e+00> : vector<2x16xf32>
    %15 = vector.multi_reduction <add>, %14, %cst_10 [2] : vector<2x16x16xf32> to vector<2x16xf32>
    %16 = vector.shape_cast %15 : vector<2x16xf32> to vector<2x16x1xf32>
    %17 = tpu.reciprocal %16 : vector<2x16x1xf32> -> vector<2x16x1xf32>
    %18 = vector.broadcast %17 : vector<2x16x1xf32> to vector<2x16x16xf32>
    %19 = arith.mulf %14, %18 : vector<2x16x16xf32>
    %c0_11 = arith.constant 0 : index
    %c0_12 = arith.constant 0 : index
    %c0_13 = arith.constant 0 : index
    %20 = vector.load %arg8[%c0_11, %c0_12, %c0_13] : memref<2x16x128xf32, #tpu.memory_space<vmem>>, vector<2x16x128xf32>
    "tpu.trace_start"() <{level = 10 : i32, message = "bqk,bkd->bqd"}> : () -> ()
    %cst_14 = arith.constant dense<0.000000e+00> : vector<2x16x128xf32>
    %21 = tpu.matmul %19, %20, %cst_14 {dimension_numbers = #tpu.dot_dimension_numbers<[2], [1], [1], [2], [0, 0, 0, 1, 1, 2], [0], [0]>} : vector<2x16x16xf32>, vector<2x16x128xf32>, vector<2x16x128xf32> -> vector<2x16x128xf32>
    "tpu.trace_stop"() : () -> ()
    %22 = vector.shape_cast %21 : vector<2x16x128xf32> to vector<32x128xf32>
    %c0_15 = arith.constant 0 : index
    %c0_16 = arith.constant 0 : index
    %23 = vector.load %arg5[%c0_15, %c0_16] : memref<128x128xf32, #tpu.memory_space<vmem>>, vector<128x128xf32>
    %cst_17 = arith.constant dense<0.000000e+00> : vector<32x128xf32>
    %24 = tpu.matmul %22, %23, %cst_17 {dimension_numbers = #tpu.dot_dimension_numbers<[1], [0], [0], [1], [0, 0, 1, 1], [], []>} : vector<32x128xf32>, vector<128x128xf32>, vector<32x128xf32> -> vector<32x128xf32>
    %25 = vector.shape_cast %24 : vector<32x128xf32> to vector<2x16x128xf32>
    %c0_18 = arith.constant 0 : index
    %c0_19 = arith.constant 0 : index
    %c0_20 = arith.constant 0 : index
    %26 = vector.load %arg6[%c0_18, %c0_19, %c0_20] : memref<2x16x128xf32, #tpu.memory_space<vmem>>, vector<2x16x128xf32>
    tpu.vector_store %arg6[%c0_18, %c0_19, %c0_20], %25 {strides = array<i32>} : memref<2x16x128xf32, #tpu.memory_space<vmem>>, vector<2x16x128xf32>,
    return
  }
  func.func @transform_0(%arg0: i32, %arg1: i32) -> (i32, i32, i32) {
    %c0_i32 = arith.constant 0 : i32
    %c0_i32_0 = arith.constant 0 : i32
    %c0_i32_1 = arith.constant 0 : i32
    return %arg0, %c0_i32, %c0_i32_0 : i32, i32, i32
  }
  func.func @transform_1(%arg0: i32, %arg1: i32) -> (i32, i32) {
    %c0_i32 = arith.constant 0 : i32
    %c0_i32_0 = arith.constant 0 : i32
    %c0_i32_1 = arith.constant 0 : i32
    return %c0_i32, %c0_i32_0 : i32, i32
  }
  func.func @transform_2(%arg0: i32, %arg1: i32) -> (i32, i32) {
    %c0_i32 = arith.constant 0 : i32
    %c0_i32_0 = arith.constant 0 : i32
    %c0_i32_1 = arith.constant 0 : i32
    return %c0_i32, %c0_i32_0 : i32, i32
  }
  func.func @transform_3(%arg0: i32, %arg1: i32) -> (i32, i32) {
    %c0_i32 = arith.constant 0 : i32
    %c0_i32_0 = arith.constant 0 : i32
    %c0_i32_1 = arith.constant 0 : i32
    return %c0_i32, %c0_i32_0 : i32, i32
  }
  func.func @transform_4(%arg0: i32, %arg1: i32) -> (i32, i32, i32) {
    %c0_i32 = arith.constant 0 : i32
    %c0_i32_0 = arith.constant 0 : i32
    return %arg0, %arg1, %c0_i32 : i32, i32, i32
  }
}

</mosaic_0001>

<bundles_post_ra>
// kernel: tpu_custom_call.1
= control target key start
LH: loop header
LB: loop body
LE: loop exit
PB: predicated region body
PF: predicated region fallthrough
CT: control target
= control target key end

     0   :  { %s2406_s0 = inlined_call_operand.hbm [shape: f32[4,16,128], index: 0, kind: input, shape index: {}]   ;;  %s2407_s1 = inlined_call_operand.hbm [shape: f32[128,128], index: 1, kind: input, shape index: {}]   ;;  %s2408_s2 = inlined_call_operand.hbm [shape: f32[128,256], index: 2, kind: input, shape index: {}]   ;;  %s2409_s3 = inlined_call_operand.hbm [shape: f32[128,128], index: 3, kind: input, shape index: {}]   ;;  %s2410_s4 = inlined_call_operand.hbm [shape: f32[4,16,128], index: 4, kind: output, shape index: {}]  }
   0x1   :  { %2419 = sst [smem:[#allocation17_spill]] %s2407_s1 }
   0x2   :  { %9 = vsyncpa [#allocation5], 0 }
   0x3   :  { %11 = vsyncpa [#allocation5 + $0x1], 0 }
   0x4   :  { %12 = vsyncpa [#allocation8], 0 }
   0x5   :  { %13 = vsyncpa [#allocation11], 0 }
   0x6   :  { %14 = vsyncpa [#allocation6], 0 }
   0x7   :  { %16 = vsyncpa [#allocation6 + $0x1], 0  ;;  %s2044_s15 = smov 0   ;;  %s2046_s16 = smov 0  }
   0x8   :  { %s2048_s17 = smov 0   ;;  %s2050_s18 = smov 0  }
   0x9   :  { %s2052_s19 = smov 0   ;;  %s2054_s20 = smov 0  }
   0xa LB: > { %s1242_s21 = sadd.s32 4294967295, %s2005_s20   ;;  %s1243_s22 = sadd.s32 4294967294, %s2005_s20   ;;  %s2005_s20 = sphi %s2054_s20, %s22_s20   ;;  %s2001_s19 = sphi %s2052_s19, %s2443_s19   ;;  %s1997_s18 = sphi %s2050_s18, %s2442_s18   ;;  %s1993_s17 = sphi %s2048_s17, %s2441_s17   ;;  %s1989_s16 = sphi %s2046_s16, %s2440_s16   ;;  %s1985_s15 = sphi %s2044_s15, %s2439_s15  }
   0xb   : > { %p54_p0 = scmp.ne.s32.totalorder %s1989_s16, %s1985_s15  ;;  %p2078_p1 = scmp.eq.s32.totalorder %s1242_s21, 0 }
   0xc   : > { %p2082_p2 = scmp.eq.s32.totalorder %s1242_s21, 1  ;;  %p149_p3 = scmp.eq.s32.totalorder %s1243_s22, 1 }
   0xd   : > { %s2420_s23 = scalar_select %p2078_p1, 1, 0 }
   0xe   : > { %s2421_s24 = scalar_select %p2082_p2, 1, 0 }
   0xf   : > { %p2088_p4 = por %p2078_p1, %p54_p0  ;;  %p1244_p5 = scmp.ge.s32.totalorder %s2005_s20, 1 }
  0x10   : > { %p2093_p6 = por %p149_p3, %p54_p0  ;;  %p156_p7 = scmp.lt.s32.totalorder %s2005_s20, 3 }
  0x11   : > { %s2422_s25 = scalar_select %p2088_p4, 1, 0 }
  0x12   : > { %s2423_s26 = scalar_select %p2093_p6, 1, 0 }
  0x13   : > { %p2098_p8 = pnand %p1244_p5, %p156_p7  ;;  %s2007_s28 = smov [#allocation7]  }
  0x14   : > { %s168_s29 = sshll.u32 %s2007_s28, 4  ;;  %s2008_s5 = smov [#allocation9]   ;;  %s2102_s29 = int_to_ptr.vmem [resolvable:$true] %s168_s29 }
  0x15   : > { %s2424_s27 = scalar_select %p2098_p8, 1, 0 }
  0x16   : > { %p1701_p9 = pneg %p2098_p8  ;;  %s181_s6 = sshll.u32 %s2008_s5, 4  ;;  %s2113_s6 = int_to_ptr.vmem [resolvable:$true] %s181_s6 }
  0x17   : > { %s2426_s1 = sld [smem:[#allocation17_spill]] }
  0x18   : > { %p2109_p11 = pnand %p1701_p9, %p2078_p1 }
  0x1a   : > { %p2123_p13 = pneg %p2109_p11 }
  0x1d   : > { %s1801_s9 = scalar_lea.hbm %s2426_s1, 2048 }
  0x1e   : > { %p1802_p12 = scmp.ne.s32.totalorder %s2426_s1, %s1801_s9  ;;  %p1808_p5 = scmp.lt.u32.totalorder %s1801_s9, %s2426_s1 }
  0x20   : > { %p1804_p0 = pnand %p2123_p13, %p1802_p12 }
  0x22   : > { %p1805_p3 = pneg %p1804_p0 }
  0x24   : > { %p1810_p7 = pnand %p1808_p5, %p1805_p3 }
  0x26   : > { %1813 = shalt.err (!%p1810_p7)
}
  0x27   : > { %s1814_s21 = scalar_lea.vmem %s2102_s29, 2048  ;;  %p1822_p1 = scmp.lt.s32.totalorder %s2102_s29, %s2102_s29 }
  0x28   : > { %p1815_p9 = scmp.ne.s32.totalorder %s2102_s29, %s1814_s21  ;;  %p1823_p4 = scmp.lt.s32.totalorder %s1814_s21, %s1814_s21 }
  0x2a   : > { %p1817_p10 = pnand %p1815_p9, %p2123_p13  ;;  %p1824_p12 = por %p1823_p4, %p1822_p1 }
  0x2c   : > { %p1818_p6 = pneg %p1817_p10 }
  0x2e   : > { %p1825_p0 = pnand %p1824_p12, %p1818_p6 }
  0x30   : > { %1828 = shalt.err (!%p1825_p0)
}
  0x31   : > { %s2414_s22 = smov 128   ;;  %s2416_s28 = smov 8  }
  0x32   : > { %1704 = dma.hbm_to_vmem [thread:$0]  (!%p2109_p11), %s2426_s1, 2048, %s2102_s29, [#allocation8], %s2414_s22, %s2414_s22, %s2416_s28  }
  0x33   : > { %s1829_s10 = scalar_lea.hbm %s2408_s2, 4096 }
  0x34   : > { %p1830_p1 = scmp.ne.s32.totalorder %s2408_s2, %s1829_s10  ;;  %p1836_p10 = scmp.lt.u32.totalorder %s1829_s10, %s2408_s2 }
  0x36   : > { %p1832_p4 = pnand %p1830_p1, %p2123_p13 }
  0x38   : > { %p1833_p6 = pneg %p1832_p4 }
  0x3a   : > { %p1838_p3 = pnand %p1836_p10, %p1833_p6 }
  0x3c   : > { %1841 = shalt.err (!%p1838_p3)
}
  0x3d   : > { %s1842_s29 = scalar_lea.vmem %s2113_s6, 4096  ;;  %p1850_p12 = scmp.lt.s32.totalorder %s2113_s6, %s2113_s6 }
  0x3e   : > { %p1843_p5 = scmp.ne.s32.totalorder %s2113_s6, %s1842_s29  ;;  %p1851_p0 = scmp.lt.s32.totalorder %s1842_s29, %s1842_s29 }
  0x40   : > { %p1845_p7 = pnand %p1843_p5, %p2123_p13  ;;  %p1852_p1 = por %p1851_p0, %p1850_p12 }
  0x42   : > { %p1846_p9 = pneg %p1845_p7 }
  0x44   : > { %p1853_p4 = pnand %p1852_p1, %p1846_p9 }
  0x46   : > { %1856 = shalt.err (!%p1853_p4)
}
  0x47   : > { %s2011_s5 = smov 256   ;;  %s2012_s7 = smov 16  }
  0x48   : > { %1707 = dma.hbm_to_vmem [thread:$0]  (!%p2109_p11), %s2408_s2, 4096, %s2113_s6, [#allocation8], %s2011_s5, %s2011_s5, %s2012_s7  }
  0x49   : > { %s2013_s10 = smov [#allocation10]   ;;  %s1857_s21 = scalar_lea.hbm %s2409_s3, 2048 }
  0x4a   : > { %s194_s11 = sshll.u32 %s2013_s10, 4  ;;  %p1858_p6 = scmp.ne.s32.totalorder %s2409_s3, %s1857_s21  ;;  %s195_s11 = int_to_ptr.vmem [resolvable:$true] %s194_s11 }
  0x4b   : > { %p1864_p5 = scmp.lt.u32.totalorder %s1857_s21, %s2409_s3 }
  0x4c   : > { %p1860_p10 = pnand %p1858_p6, %p2123_p13 }
  0x4e   : > { %p1861_p3 = pneg %p1860_p10 }
  0x50   : > { %p1866_p7 = pnand %p1864_p5, %p1861_p3 }
  0x52   : > { %1869 = shalt.err (!%p1866_p7)
}
  0x53   : > { %s1870_s6 = scalar_lea.vmem %s195_s11, 2048  ;;  %p1878_p1 = scmp.lt.s32.totalorder %s195_s11, %s195_s11 }
  0x54   : > { %p1871_p9 = scmp.ne.s32.totalorder %s195_s11, %s1870_s6  ;;  %p1879_p4 = scmp.lt.s32.totalorder %s1870_s6, %s1870_s6 }
  0x56   : > { %p1873_p12 = pnand %p1871_p9, %p2123_p13  ;;  %p1880_p8 = por %p1879_p4, %p1878_p1 }
  0x58   : > { %p1874_p0 = pneg %p1873_p12 }
  0x5a   : > { %p1881_p2 = pnand %p1880_p8, %p1874_p0 }
  0x5c   : > { %1884 = shalt.err (!%p1881_p2)
}
  0x5d   : > { %s2428_s22 = smov 8   ;;  %s2429_s5 = smov 128  }
  0x5e   : > { %1710 = dma.hbm_to_vmem [thread:$0]  (!%p2109_p11), %s2409_s3, 2048, %s195_s11, [#allocation11], %s2429_s5, %s2429_s5, %s2428_s22  }
  0x5f   : > { %s34_s12 = sadd.s32 1, %s2001_s19  ;;  %s41_s30 = sadd.s32 1, %s1993_s17 }
  0x60   : > { %p36_p2 = scmp.ge.s32.totalorder %s34_s12, 2  ;;  %p48_p8 = scmp.ne.s32.totalorder %s1993_s17, %s1989_s16 }
  0x61   : > { %p49_p13 = scmp.eq.s32.totalorder %s2005_s20, 0  ;;  %p2431_p10 = scmp.ne.s32.totalorder %s2421_s24, 0 }
  0x62   : > { %s2445_s12 = smov (%p36_p2, %s34_s12), 0  ;;  %p1722_p11 = scmp.lt.s32.totalorder %s2005_s20, 2 }
  0x63   : > { %p2198_p6 = por %p49_p13, %p48_p8  ;;  %p2204_p3 = por %p2431_p10, %p48_p8 }
  0x64   : > { %s38_s9 = ssub.s32 %s2001_s19, %s2445_s12  ;;  %s208_s10 = sand.u32 1, %s1993_s17  }
  0x65   : > { %p39_p5 = scmp.eq.s32.totalorder %s38_s9, 0  ;;  %s1249_s11 = sshll.u32 %s208_s10, 5 }
  0x66   : > { %s1270_s14 = sshll.u32 %s2001_s19, 9  ;;  %s212_s24 = scalar_lea.vmem [#allocation4], %s1249_s11 }
  0x67   : > { %s2213_s13 = scalar_select %p39_p5, %s1993_s17, %s41_s30  }
  0x68   : > { %s2219_s6 = scalar_lea.hbm %s2406_s0, %s1270_s14  ;;  %s220_s1 = sshll.u32 %s212_s24, 4  ;;  %s2221_s1 = int_to_ptr.vmem [resolvable:$true] %s220_s1 }
  0x69   : > { %p2225_p7 = pnand %p1722_p11, %p2198_p6  ;;  %s2229_s30 = scalar_lea.sflag [#allocation5], %s208_s10 }
  0x6a   : > { %s1885_s9 = scalar_lea.hbm %s2219_s6, 512  ;;  %s1890_s7 = scalar_lea.hbm %s2406_s0, 1024 }
  0x6b   : > { %p1886_p9 = scmp.ne.s32.totalorder %s2219_s6, %s1885_s9  ;;  %p1887_p12 = pneg %p2225_p7 }
  0x6c   : > { %p1891_p4 = scmp.lt.u32.totalorder %s2219_s6, %s2406_s0  ;;  %p1892_p2 = scmp.lt.u32.totalorder %s1890_s7, %s1885_s9 }
  0x6d   : > { %p1888_p0 = pnand %p1887_p12, %p1886_p9  ;;  %p1894_p13 = scmp.lt.u32.totalorder %s1885_s9, %s2219_s6 }
  0x6e   : > { %p1893_p8 = por %p1892_p2, %p1891_p4 }
  0x6f   : > { %p1889_p1 = pneg %p1888_p0 }
  0x70   : > { %p1895_p6 = por %p1894_p13, %p1893_p8 }
  0x72   : > { %p1896_p10 = pnand %p1895_p6, %p1889_p1 }
  0x74   : > { %1899 = shalt.err (!%p1896_p10)
}
  0x75   : > { %s1900_s10 = scalar_lea.vmem %s2221_s1, 512  ;;  %s2014_s24 = smov [#allocation4]  }
  0x76   : > { %p1901_p11 = scmp.ne.s32.totalorder %s2221_s1, %s1900_s10  ;;  %s1905_s11 = sshll.u32 %s2014_s24, 4  ;;  %s1906_s11 = int_to_ptr.vmem [resolvable:$false] %s1905_s11 }
  0x77   : > { %s1907_s14 = scalar_lea.vmem %s1906_s11, 1024  ;;  %p1908_p0 = scmp.lt.s32.totalorder %s2221_s1, %s1906_s11 }
  0x78   : > { %p1903_p5 = pnand %p1901_p11, %p1887_p12  ;;  %p1909_p4 = scmp.lt.s32.totalorder %s1907_s14, %s1900_s10 }
  0x7a   : > { %p1904_p9 = pneg %p1903_p5  ;;  %p1910_p2 = por %p1909_p4, %p1908_p0 }
  0x7c   : > { %p1911_p8 = pnand %p1910_p2, %p1904_p9 }
  0x7e   : > { %1914 = shalt.err (!%p1911_p8)
}
  0x7f   : > { %1714 = dma.hbm_to_vmem [thread:$0]  (!%p2225_p7), %s2219_s6, 512, %s2221_s1, %s2229_s30, %s2429_s5, %s2429_s5, %s2428_s22  }
  0x80   : > { %p2434_p12 = scmp.ne.s32.totalorder %s2424_s27, 0 }
  0x81   : > { %s2263_s9 = sand.u32 (!%p2434_p12), 1, %s1989_s16   ;;  %p2435_p1 = scmp.ne.s32.totalorder (!%p2434_p12), %s2422_s25, 0 }
  0x82   : > { %232 = sbr.rel (%p2434_p12) target bundleno = 1574 (0x626), region = 36  ;;  %s1254_s7 = sshll.u32 (!%p2434_p12), %s2263_s9, 5 }
  0x83   : > { %s235_s21 = scalar_lea.sflag (!%p2434_p12), [#allocation5], %s2263_s9  ;;  %s2269_s28 = scalar_lea.vmem (!%p2434_p12), [#allocation4], %s1254_s7 }
  0x89   : > { %1968 = dma.done.wait (%p2435_p1), %s235_s21, 512  }
  0x8a   : > { %1970 = vsyncadd (%p2435_p1), %s235_s21, 4294966784  ;;  %p2436_p7 = scmp.ne.s32.totalorder %s2420_s23, 0 }
  0x8c   : > { %1972 = dma.done.wait (%p2436_p7), [#allocation8], 6144  }
  0x8d   : > { %1974 = vsyncadd (%p2436_p7), [#allocation8], 4294961152 }
  0x8e   : > { %1976 = dma.done.wait (%p2436_p7), [#allocation11], 2048  }
  0x8f   : > { %1978 = vsyncadd (%p2436_p7), [#allocation11], 4294965248  ;;  %v2015_v0 = vmov 0.0   ;;  %v287_v1 = vld [vmem:[#allocation9 + $0x8] sm:$0xff]  ;;  %v289_v2 = vld [vmem:[#allocation9 + $0x18] sm:$0xff]  ;;  %vm439_vm0 = vcmask 130048  }
  0x90   : > { %382 = vmatprep.mubr.f32.mxu1 %v2015_v0  ;;  %v286_v3 = vld [vmem:[#allocation9] sm:$0xff]  ;;  %v1517_v4 = vpack.c.bf16 %v289_v2, %v287_v1  ;;  %v288_v5 = vld [vmem:[#allocation9 + $0x10] sm:$0xff]  ;;  %v291_v6 = vld [vmem:[#allocation9 + $0x28] sm:$0xff]  ;;  %s274_s23 = scalar_lea.vmem [#allocation12], %s1254_s7  ;;  %s1272_s27 = sshll.u32 %s1997_s18, 9 }
  0x91   : > { %v293_v7 = vld [vmem:[#allocation9 + $0x38] sm:$0xff]  ;;  %v1519_v8 = vpack.c.bf16 %v288_v5, %v286_v3  ;;  %v290_v10 = vld [vmem:[#allocation9 + $0x20] sm:$0xff]  ;;  %v292_v11 = vld [vmem:[#allocation9 + $0x30] sm:$0xff]  ;;  %s1129_s25 = sshll.u32 %s274_s23, 4  ;;  %s2357_s6 = scalar_lea.hbm %s2410_s4, %s1272_s27  ;;  %s2352_s25 = int_to_ptr.vmem [resolvable:$true] %s1129_s25 }
  0x92   : > { %v1521_v9 = vpack.c.bf16 %v293_v7, %v291_v6  ;;  %v295_v12 = vld [vmem:[#allocation9 + $0x48] sm:$0xff]  ;;  %1518 = vmatprep.subr.bf16.mxu1 %v1517_v4  ;;  %v297_v13 = vld [vmem:[#allocation9 + $0x58] sm:$0xff]  ;;  %v1523_v14 = vpack.c.bf16 %v292_v11, %v290_v10  ;;  %v294_v16 = vld [vmem:[#allocation9 + $0x40] sm:$0xff]  ;;  %s1113_s1 = scalar_lea.sflag [#allocation6], %s2263_s9  ;;  %s1915_s30 = scalar_lea.vmem %s2352_s25, 512 }
  0x93   : > { %1520 = vmatpush1.bf16.msra.mxu1 %v1519_v8  ;;  %v1525_v15 = vpack.c.bf16 %v297_v13, %v295_v12  ;;  %v296_v17 = vld [vmem:[#allocation9 + $0x50] sm:$0xff]  ;;  %v299_v18 = vld [vmem:[#allocation9 + $0x68] sm:$0xff]  ;;  %v301_v19 = vld [vmem:[#allocation9 + $0x78] sm:$0xff]  ;;  %p1916_p13 = scmp.ne.s32.totalorder %s2352_s25, %s1915_s30  ;;  %s2016_s18 = smov [#allocation12]  }
  0x94   : > { %1522 = vmatprep.subr.bf16.mxu1 %v1521_v9  ;;  %v1527_v20 = vpack.c.bf16 %v296_v17, %v294_v16  ;;  %v1529_v21 = vpack.c.bf16 %v301_v19, %v299_v18  ;;  %v298_v22 = vld [vmem:[#allocation9 + $0x60] sm:$0xff]  ;;  %v300_v23 = vld [vmem:[#allocation9 + $0x70] sm:$0xff]  ;;  %v303_v24 = vld [vmem:[#allocation9 + $0x88] sm:$0xff]  ;;  %s1919_s29 = sshll.u32 %s2016_s18, 4  ;;  %s1920_s29 = int_to_ptr.vmem [resolvable:$false] %s1919_s29 }
  0x95   : > { %v305_v25 = vld [vmem:[#allocation9 + $0x98] sm:$0xff]  ;;  %v1531_v26 = vpack.c.bf16 %v300_v23, %v298_v22  ;;  %v302_v28 = vld [vmem:[#allocation9 + $0x80] sm:$0xff]  ;;  %v304_v29 = vld [vmem:[#allocation9 + $0x90] sm:$0xff]  ;;  %p1917_p6 = pnand %p1916_p13, %p2204_p3  ;;  %s1921_s10 = scalar_lea.vmem %s1920_s29, 1024 }
  0x96   : > { %v1533_v27 = vpack.c.bf16 %v305_v25, %v303_v24  ;;  %v307_v30 = vld [vmem:[#allocation9 + $0xa8] sm:$0xff]  ;;  %v309_v31 = vld [vmem:[#allocation9 + $0xb8] sm:$0xff]  ;;  %v1535_v32 = vpack.c.bf16 %v304_v29, %v302_v28  ;;  %v306_v34 = vld [vmem:[#allocation9 + $0xa0] sm:$0xff]  ;;  %p1922_p11 = scmp.lt.s32.totalorder %s2352_s25, %s1920_s29  ;;  %p1923_p5 = scmp.lt.s32.totalorder %s1921_s10, %s1915_s30 }
  0x97   : > { %1524 = vmatpush1.bf16.msra.mxu1 %v1523_v14  ;;  %v1537_v33 = vpack.c.bf16 %v309_v31, %v307_v30  ;;  %v308_v35 = vld [vmem:[#allocation9 + $0xb0] sm:$0xff]  ;;  %v311_v36 = vld [vmem:[#allocation9 + $0xc8] sm:$0xff]  ;;  %v313_v37 = vld [vmem:[#allocation9 + $0xd8] sm:$0xff]  ;;  %p1918_p10 = pneg %p1917_p6 }
  0x98   : > { %1526 = vmatprep.subr.bf16.mxu1 %v1525_v15  ;;  %v1539_v38 = vpack.c.bf16 %v308_v35, %v306_v34  ;;  %v1541_v39 = vpack.c.bf16 %v313_v37, %v311_v36  ;;  %v310_v40 = vld [vmem:[#allocation9 + $0xc0] sm:$0xff]  ;;  %v312_v41 = vld [vmem:[#allocation9 + $0xd0] sm:$0xff]  ;;  %v315_v42 = vld [vmem:[#allocation9 + $0xe8] sm:$0xff]  ;;  %p1924_p9 = por %p1923_p5, %p1922_p11 }
  0x99   : > { %v317_v43 = vld [vmem:[#allocation9 + $0xf8] sm:$0xff]  ;;  %v1543_v44 = vpack.c.bf16 %v312_v41, %v310_v40  ;;  %v314_v46 = vld [vmem:[#allocation9 + $0xe0] sm:$0xff]  ;;  %v316_v47 = vld [vmem:[#allocation9 + $0xf0] sm:$0xff] }
  0x9a   : > { %v1545_v45 = vpack.c.bf16 %v317_v43, %v315_v42  ;;  %v513_v48 = vld [vmem:[#allocation7] sm:$0xff]  ;;  %v514_v49 = vld [vmem:[#allocation7 + $0x8] sm:$0xff]  ;;  %v1547_v50 = vpack.c.bf16 %v316_v47, %v314_v46  ;;  %v515_v52 = vld [vmem:[#allocation7 + $0x10] sm:$0xff]  ;;  %p1925_p0 = pnand %p1924_p9, %p1918_p10 }
  0x9b   : > { %1528 = vmatpush1.bf16.msra.mxu1 %v1527_v20  ;;  %v1549_v51 = vpack.c.bf16 %v514_v49, %v513_v48  ;;  %v516_v53 = vld [vmem:[#allocation7 + $0x18] sm:$0xff]  ;;  %v282_v54 = vld [vmem:[%s2269_s28] sm:$0xff]  ;;  %v518_v57 = vld [vmem:[#allocation7 + $0x28] sm:$0xff] }
  0x9c   : > { %1530 = vmatprep.subr.bf16.mxu1 %v1529_v21  ;;  %v1553_v55 = vpack.c.bf16 %v516_v53, %v515_v52  ;;  %v517_v56 = vld [vmem:[#allocation7 + $0x20] sm:$0xff]  ;;  %v283_v58 = vld [vmem:[%s2269_s28 + $0x8] sm:$0xff]  ;;  %v519_v60 = vld [vmem:[#allocation7 + $0x30] sm:$0xff] }
  0x9d   : > { %v1557_v59 = vpack.c.bf16 %v518_v57, %v517_v56  ;;  %v520_v61 = vld [vmem:[#allocation7 + $0x38] sm:$0xff]  ;;  %v284_v62 = vld [vmem:[%s2269_s28 + $0x10] sm:$0xff]  ;;  %v521_v1 = vld [vmem:[#allocation7 + $0x40] sm:$0xff] }
  0x9e   : > { %v1561_v63 = vpack.c.bf16 %v520_v61, %v519_v60  ;;  %v522_v2 = vld [vmem:[#allocation7 + $0x48] sm:$0xff]  ;;  %v285_v3 = vld [vmem:[%s2269_s28 + $0x18] sm:$0xff]  ;;  %v523_v5 = vld [vmem:[#allocation7 + $0x50] sm:$0xff] }
  0x9f   : > { %1532 = vmatpush1.bf16.msra.mxu1 %v1531_v26  ;;  %v1565_v4 = vpack.c.bf16 %v522_v2, %v521_v1  ;;  %v524_v6 = vld [vmem:[#allocation7 + $0x58] sm:$0xff]  ;;  %v525_v8 = vld [vmem:[#allocation7 + $0x60] sm:$0xff]  ;;  %v526_v9 = vld [vmem:[#allocation7 + $0x68] sm:$0xff] }
  0xa0   : > { %1534 = vmatprep.subr.bf16.mxu1 %v1533_v27  ;;  %v1569_v7 = vpack.c.bf16 %v524_v6, %v523_v5  ;;  %v1573_v10 = vpack.c.bf16 %v526_v9, %v525_v8  ;;  %v527_v11 = vld [vmem:[#allocation7 + $0x70] sm:$0xff]  ;;  %v528_v12 = vld [vmem:[#allocation7 + $0x78] sm:$0xff] }
  0xa3   : > { %1536 = vmatpush1.bf16.msra.mxu1 %v1535_v32 }
  0xa4   : > { %1538 = vmatprep.subr.bf16.mxu1 %v1537_v33 }
  0xa7   : > { %1540 = vmatpush1.bf16.msra.mxu1 %v1539_v38 }
  0xa8   : > { %1542 = vmatprep.subr.bf16.mxu1 %v1541_v39 }
  0xab   : > { %1544 = vmatpush1.bf16.msra.mxu1 %v1543_v44 }
  0xac   : > { %1546 = vmatprep.subr.bf16.mxu1 %v1545_v45 }
  0xaf   : > { %1548 = vmatpush1.bf16.msra.mxu1 %v1547_v50 }
  0xb0   : > { %1550 = vmatprep.subr.bf16.mxu1 %v1549_v51 }
  0xb2   : > { %383 = vmatmul.mubr.f32.vlgmr.msra.gmra.mrb[0].mxu1 %v282_v54 }
  0xb3   : > { %388 = vmatprep.mubr.f32.mxu1 %v2015_v0  ;;  %1552 = vmatpush3.bf16.msra.mxu1 %v1549_v51 }
  0xb4   : > { %1554 = vmatprep.subr.bf16.mxu1 %v1553_v55 }
  0xb6   : > { %389 = vmatmul.mubr.f32.gmra.mrb[2].mxu1 %v283_v58 }
  0xb7   : > { %394 = vmatprep.mubr.f32.mxu1 %v2015_v0  ;;  %1556 = vmatpush3.bf16.msra.mxu1 %v1553_v55 }
  0xb8   : > { %1558 = vmatprep.subr.bf16.mxu1 %v1557_v59 }
  0xba   : > { %395 = vmatmul.mubr.f32.gmra.mrb[4].mxu1 %v284_v62 }
  0xbb   : > { %400 = vmatprep.mubr.f32.mxu1 %v2015_v0  ;;  %1560 = vmatpush3.bf16.msra.mxu1 %v1557_v59  ;;  %v1577_v0 = vpack.c.bf16 %v528_v12, %v527_v11 }
  0xbc   : > { %1562 = vmatprep.subr.bf16.mxu1 %v1561_v63 }
  0xbe   : > { %401 = vmatmul.mubr.f32.gmra.mrb[6].mxu1 %v285_v3 }
  0xbf   : > { %1564 = vmatpush3.bf16.msra.mxu1 %v1561_v63  ;;  %1389 = vmatprep.mubr.f32.mxu1 %v282_v54 }
  0xc0   : > { %1566 = vmatprep.subr.bf16.mxu1 %v1565_v4 }
  0xc3   : > { %1568 = vmatpush3.bf16.msra.mxu1 %v1565_v4 }
  0xc4   : > { %1570 = vmatprep.subr.bf16.mxu1 %v1569_v7 }
  0xc7   : > { %1572 = vmatpush3.bf16.msra.mxu1 %v1569_v7 }
  0xc8   : > { %1574 = vmatprep.subr.bf16.mxu1 %v1573_v10 }
  0xcb   : > { %1576 = vmatpush3.bf16.msra.mxu1 %v1573_v10 }
  0xcc   : > { %1578 = vmatprep.subr.bf16.mxu1 %v1577_v0 }
  0xcf   : > { %1580 = vmatpush3.bf16.msra.mxu1 %v1577_v0 }
  0xd2   : > { %1390 = vmatmul.mubr.f32.vlgmr.msra.gmra.mrb[8].mxu1 %v283_v58 }
  0xd3   : > { %1392 = vmatprep.mubr.f32.mxu1 %v284_v62 }
  0xd6   : > { %1393 = vmatmul.mubr.f32.gmra.mrb[10].mxu1 %v285_v3 }
 0x185   : > { %v384_v13 = vpop.f32.mrb[0].mxu1 }
 0x186   : > { %407 = vxpose.xlu0.b32.start [1/2] (short) %v384_v13, 128  ;;  %v386_v14 = vpop.f32.mrb[1].mxu1 }
 0x189   : > { %v390_v15 = vpop.f32.mrb[2].mxu1 }
 0x18a   : > { %408 = vxpose.xlu0.b32.end [2/2] (short) %v390_v15, 128  ;;  %v392_v16 = vpop.f32.mrb[3].mxu1 }
 0x18b   : > { %v2291_v17 = vpack.c.bf16 %v392_v16, %v386_v14 }
 0x18d   : > { %v396_v18 = vpop.f32.mrb[4].mxu1 }
 0x18e   : > { %456 = vxpose.xlu1.b32.start [1/2] (short) %v396_v18, 128  ;;  %v398_v19 = vpop.f32.mrb[5].mxu1 }
 0x191   : > { %v402_v20 = vpop.f32.mrb[6].mxu1 }
 0x192   : > { %457 = vxpose.xlu1.b32.end [2/2] (short) %v402_v20, 128  ;;  %v404_v21 = vpop.f32.mrb[7].mxu1 }
 0x193   : > { %v2293_v22 = vpack.c.bf16 %v404_v21, %v398_v19 }
 0x1a5   : > { %v2295_v23 = vpop.f32.mrb[8].mxu1 }
 0x1a6   : > { %v595_v24 = vpop.f32.mrb[9].mxu1 }
 0x1a7   : > { %1427 = vmatprep.mubr.f32.mxu0 %v595_v24 }
 0x1a9   : > { %v2297_v25 = vpop.f32.mrb[10].mxu1 }
 0x1aa   : > { %v605_v26 = vpop.f32.mrb[11].mxu1 }
 0x1ab   : > { %1462 = vmatprep.mubr.f32.mxu1 %v605_v26 }
 0x206   : > { %v423_v27 = vpop.trf.xlu0 }
 0x207   : > { %440 = vst.msk [vmem:[#allocation2] sm:$0xff] %vm439_vm0, %v423_v27 }
 0x20a   : > { %v424_v28 = vpop.trf.xlu0 }
 0x20b   : > { %441 = vst.msk [vmem:[#allocation2 + $0x8] sm:$0xff] %vm439_vm0, %v424_v28 }
 0x20e   : > { %v425_v29 = vpop.trf.xlu0  ;;  %v472_v30 = vpop.trf.xlu1  ;;  %v614_v31 = vld [vmem:[#allocation2] sm:$0xff] }
 0x20f   : > { %442 = vst.msk [vmem:[#allocation2 + $0x10] sm:$0xff] %vm439_vm0, %v425_v29  ;;  %489 = vst.msk [vmem:[#allocation2 + $0x80] sm:$0xff] %vm439_vm0, %v472_v30 }
 0x212   : > { %v426_v32 = vpop.trf.xlu0  ;;  %v473_v33 = vpop.trf.xlu1  ;;  %v615_v34 = vld [vmem:[#allocation2 + $0x8] sm:$0xff] }
 0x213   : > { %443 = vst.msk [vmem:[#allocation2 + $0x18] sm:$0xff] %vm439_vm0, %v426_v32  ;;  %490 = vst.msk [vmem:[#allocation2 + $0x88] sm:$0xff] %vm439_vm0, %v473_v33  ;;  %v1581_v35 = vpack.c.bf16 %v615_v34, %v614_v31 }
 0x215   : > { %1582 = vmatprep.subr.bf16.mxu0 %v1581_v35 }
 0x216   : > { %1584 = vmatpush3.bf16.msra.mxu0 %v1581_v35  ;;  %v427_v36 = vpop.trf.xlu0  ;;  %v474_v37 = vpop.trf.xlu1  ;;  %v616_v38 = vld [vmem:[#allocation2 + $0x10] sm:$0xff]  ;;  %v630_v42 = vld [vmem:[#allocation2 + $0x80] sm:$0xff] }
 0x217   : > { %444 = vst.msk [vmem:[#allocation2 + $0x20] sm:$0xff] %vm439_vm0, %v427_v36  ;;  %491 = vst.msk [vmem:[#allocation2 + $0x90] sm:$0xff] %vm439_vm0, %v474_v37 }
 0x21a   : > { %v428_v39 = vpop.trf.xlu0  ;;  %v475_v40 = vpop.trf.xlu1  ;;  %v617_v41 = vld [vmem:[#allocation2 + $0x18] sm:$0xff]  ;;  %v631_v43 = vld [vmem:[#allocation2 + $0x88] sm:$0xff] }
 0x21b   : > { %445 = vst.msk [vmem:[#allocation2 + $0x28] sm:$0xff] %vm439_vm0, %v428_v39  ;;  %492 = vst.msk [vmem:[#allocation2 + $0x98] sm:$0xff] %vm439_vm0, %v475_v40  ;;  %v1585_v44 = vpack.c.bf16 %v617_v41, %v616_v38  ;;  %v1613_v45 = vpack.c.bf16 %v631_v43, %v630_v42 }
 0x21d   : > { %1586 = vmatprep.subr.bf16.mxu0 %v1585_v44  ;;  %1614 = vmatprep.subr.bf16.mxu1 %v1613_v45 }
 0x21e   : > { %1588 = vmatpush3.bf16.msra.mxu0 %v1585_v44  ;;  %v429_v46 = vpop.trf.xlu0  ;;  %1616 = vmatpush3.bf16.msra.mxu1 %v1613_v45  ;;  %v476_v47 = vpop.trf.xlu1  ;;  %v618_v48 = vld [vmem:[#allocation2 + $0x20] sm:$0xff]  ;;  %v632_v52 = vld [vmem:[#allocation2 + $0x90] sm:$0xff] }
 0x21f   : > { %446 = vst.msk [vmem:[#allocation2 + $0x30] sm:$0xff] %vm439_vm0, %v429_v46  ;;  %493 = vst.msk [vmem:[#allocation2 + $0xa0] sm:$0xff] %vm439_vm0, %v476_v47 }
 0x222   : > { %v430_v49 = vpop.trf.xlu0  ;;  %v477_v50 = vpop.trf.xlu1  ;;  %v619_v51 = vld [vmem:[#allocation2 + $0x28] sm:$0xff]  ;;  %v633_v53 = vld [vmem:[#allocation2 + $0x98] sm:$0xff] }
 0x223   : > { %447 = vst.msk [vmem:[#allocation2 + $0x38] sm:$0xff] %vm439_vm0, %v430_v49  ;;  %494 = vst.msk [vmem:[#allocation2 + $0xa8] sm:$0xff] %vm439_vm0, %v477_v50  ;;  %v1589_v54 = vpack.c.bf16 %v619_v51, %v618_v48  ;;  %v1617_v55 = vpack.c.bf16 %v633_v53, %v632_v52 }
 0x225   : > { %1590 = vmatprep.subr.bf16.mxu0 %v1589_v54  ;;  %1618 = vmatprep.subr.bf16.mxu1 %v1617_v55 }
 0x226   : > { %1592 = vmatpush3.bf16.msra.mxu0 %v1589_v54  ;;  %v431_v56 = vpop.trf.xlu0  ;;  %1620 = vmatpush3.bf16.msra.mxu1 %v1617_v55  ;;  %v478_v57 = vpop.trf.xlu1  ;;  %v620_v58 = vld [vmem:[#allocation2 + $0x30] sm:$0xff]  ;;  %v634_v62 = vld [vmem:[#allocation2 + $0xa0] sm:$0xff] }
 0x227   : > { %448 = vst.msk [vmem:[#allocation2 + $0x40] sm:$0xff] %vm439_vm0, %v431_v56  ;;  %495 = vst.msk [vmem:[#allocation2 + $0xb0] sm:$0xff] %vm439_vm0, %v478_v57 }
 0x22a   : > { %v432_v59 = vpop.trf.xlu0  ;;  %v479_v60 = vpop.trf.xlu1  ;;  %v621_v61 = vld [vmem:[#allocation2 + $0x38] sm:$0xff]  ;;  %v635_v63 = vld [vmem:[#allocation2 + $0xa8] sm:$0xff] }
 0x22b   : > { %449 = vst.msk [vmem:[#allocation2 + $0x48] sm:$0xff] %vm439_vm0, %v432_v59  ;;  %496 = vst.msk [vmem:[#allocation2 + $0xb8] sm:$0xff] %vm439_vm0, %v479_v60  ;;  %v1593_v1 = vpack.c.bf16 %v621_v61, %v620_v58  ;;  %v1621_v2 = vpack.c.bf16 %v635_v63, %v634_v62 }
 0x22d   : > { %1594 = vmatprep.subr.bf16.mxu0 %v1593_v1  ;;  %1622 = vmatprep.subr.bf16.mxu1 %v1621_v2 }
 0x22e   : > { %1596 = vmatpush3.bf16.msra.mxu0 %v1593_v1  ;;  %v433_v3 = vpop.trf.xlu0  ;;  %1624 = vmatpush3.bf16.msra.mxu1 %v1621_v2  ;;  %v480_v4 = vpop.trf.xlu1  ;;  %v622_v5 = vld [vmem:[#allocation2 + $0x40] sm:$0xff]  ;;  %v636_v9 = vld [vmem:[#allocation2 + $0xb0] sm:$0xff] }
 0x22f   : > { %450 = vst.msk [vmem:[#allocation2 + $0x50] sm:$0xff] %vm439_vm0, %v433_v3  ;;  %497 = vst.msk [vmem:[#allocation2 + $0xc0] sm:$0xff] %vm439_vm0, %v480_v4 }
 0x232   : > { %v434_v6 = vpop.trf.xlu0  ;;  %v481_v7 = vpop.trf.xlu1  ;;  %v623_v8 = vld [vmem:[#allocation2 + $0x48] sm:$0xff]  ;;  %v637_v10 = vld [vmem:[#allocation2 + $0xb8] sm:$0xff] }
 0x233   : > { %451 = vst.msk [vmem:[#allocation2 + $0x58] sm:$0xff] %vm439_vm0, %v434_v6  ;;  %498 = vst.msk [vmem:[#allocation2 + $0xc8] sm:$0xff] %vm439_vm0, %v481_v7  ;;  %v1597_v11 = vpack.c.bf16 %v623_v8, %v622_v5  ;;  %v1625_v12 = vpack.c.bf16 %v637_v10, %v636_v9 }
 0x235   : > { %1598 = vmatprep.subr.bf16.mxu0 %v1597_v11  ;;  %1626 = vmatprep.subr.bf16.mxu1 %v1625_v12 }
 0x236   : > { %1600 = vmatpush3.bf16.msra.mxu0 %v1597_v11  ;;  %v435_v0 = vpop.trf.xlu0  ;;  %1628 = vmatpush3.bf16.msra.mxu1 %v1625_v12  ;;  %v482_v13 = vpop.trf.xlu1  ;;  %v624_v14 = vld [vmem:[#allocation2 + $0x50] sm:$0xff]  ;;  %v638_v19 = vld [vmem:[#allocation2 + $0xc0] sm:$0xff] }
 0x237   : > { %452 = vst.msk [vmem:[#allocation2 + $0x60] sm:$0xff] %vm439_vm0, %v435_v0  ;;  %499 = vst.msk [vmem:[#allocation2 + $0xd0] sm:$0xff] %vm439_vm0, %v482_v13  ;;  %v1007_v0 = vld [vmem:[#allocation10] sm:$0xff]  ;;  %v1008_v13 = vld [vmem:[#allocation10 + $0x8] sm:$0xff] }
 0x23a   : > { %v436_v15 = vpop.trf.xlu0  ;;  %v483_v16 = vpop.trf.xlu1  ;;  %v625_v18 = vld [vmem:[#allocation2 + $0x58] sm:$0xff]  ;;  %v639_v20 = vld [vmem:[#allocation2 + $0xc8] sm:$0xff] }
 0x23b   : > { %453 = vst.msk [vmem:[#allocation2 + $0x68] sm:$0xff] %vm439_vm0, %v436_v15  ;;  %500 = vst.msk [vmem:[#allocation2 + $0xd8] sm:$0xff] %vm439_vm0, %v483_v16  ;;  %v1601_v21 = vpack.c.bf16 %v625_v18, %v624_v14  ;;  %v1629_v24 = vpack.c.bf16 %v639_v20, %v638_v19  ;;  %v1653_v19 = vpack.c.bf16 %v1008_v13, %v1007_v0 }
 0x23d   : > { %1602 = vmatprep.subr.bf16.mxu0 %v1601_v21  ;;  %1630 = vmatprep.subr.bf16.mxu1 %v1629_v24 }
 0x23e   : > { %1604 = vmatpush3.bf16.msra.mxu0 %v1601_v21  ;;  %v437_v26 = vpop.trf.xlu0  ;;  %1632 = vmatpush3.bf16.msra.mxu1 %v1629_v24  ;;  %v484_v27 = vpop.trf.xlu1  ;;  %v626_v28 = vld [vmem:[#allocation2 + $0x60] sm:$0xff]  ;;  %v640_v32 = vld [vmem:[#allocation2 + $0xd0] sm:$0xff] }
 0x23f   : > { %454 = vst.msk [vmem:[#allocation2 + $0x70] sm:$0xff] %vm439_vm0, %v437_v26  ;;  %501 = vst.msk [vmem:[#allocation2 + $0xe0] sm:$0xff] %vm439_vm0, %v484_v27  ;;  %v1009_v24 = vld [vmem:[#allocation10 + $0x10] sm:$0xff]  ;;  %v1010_v26 = vld [vmem:[#allocation10 + $0x18] sm:$0xff] }
 0x242   : > { %v438_v29 = vpop.trf.xlu0  ;;  %v485_v30 = vpop.trf.xlu1  ;;  %v627_v31 = vld [vmem:[#allocation2 + $0x68] sm:$0xff]  ;;  %v641_v33 = vld [vmem:[#allocation2 + $0xd8] sm:$0xff] }
 0x243   : > { %455 = vst.msk [vmem:[#allocation2 + $0x78] sm:$0xff] %vm439_vm0, %v438_v29  ;;  %502 = vst.msk [vmem:[#allocation2 + $0xe8] sm:$0xff] %vm439_vm0, %v485_v30  ;;  %v1605_v34 = vpack.c.bf16 %v627_v31, %v626_v28  ;;  %v1633_v35 = vpack.c.bf16 %v641_v33, %v640_v32  ;;  %v1657_v29 = vpack.c.bf16 %v1010_v26, %v1009_v24  ;;  %v1011_v30 = vld [vmem:[#allocation10 + $0x20] sm:$0xff]  ;;  %v1012_v31 = vld [vmem:[#allocation10 + $0x28] sm:$0xff] }
 0x244   : > { %v1661_v32 = vpack.c.bf16 %v1012_v31, %v1011_v30  ;;  %v1013_v33 = vld [vmem:[#allocation10 + $0x30] sm:$0xff] }
 0x245   : > { %1606 = vmatprep.subr.bf16.mxu0 %v1605_v34  ;;  %1634 = vmatprep.subr.bf16.mxu1 %v1633_v35 }
 0x246   : > { %1608 = vmatpush3.bf16.msra.mxu0 %v1605_v34  ;;  %1636 = vmatpush3.bf16.msra.mxu1 %v1633_v35  ;;  %v486_v36 = vpop.trf.xlu1  ;;  %v628_v37 = vld [vmem:[#allocation2 + $0x70] sm:$0xff]  ;;  %v642_v40 = vld [vmem:[#allocation2 + $0xe0] sm:$0xff]  ;;  %v1014_v34 = vld [vmem:[#allocation10 + $0x38] sm:$0xff] }
 0x247   : > { %503 = vst.msk [vmem:[#allocation2 + $0xf0] sm:$0xff] %vm439_vm0, %v486_v36  ;;  %v1015_v35 = vld [vmem:[#allocation10 + $0x40] sm:$0xff]  ;;  %v1016_v36 = vld [vmem:[#allocation10 + $0x48] sm:$0xff] }
 0x24a   : > { %v487_v38 = vpop.trf.xlu1  ;;  %v629_v39 = vld [vmem:[#allocation2 + $0x78] sm:$0xff]  ;;  %v643_v41 = vld [vmem:[#allocation2 + $0xe8] sm:$0xff] }
 0x24b   : > { %504 = vst.msk [vmem:[#allocation2 + $0xf8] sm:$0xff] %vm439_vm0, %v487_v38  ;;  %v1609_v42 = vpack.c.bf16 %v629_v39, %v628_v37  ;;  %v1637_v43 = vpack.c.bf16 %v643_v41, %v642_v40  ;;  %v1669_v37 = vpack.c.bf16 %v1016_v36, %v1015_v35  ;;  %v1017_v38 = vld [vmem:[#allocation10 + $0x50] sm:$0xff]  ;;  %v1018_v39 = vld [vmem:[#allocation10 + $0x58] sm:$0xff]  ;;  %v1019_v41 = vld [vmem:[#allocation10 + $0x60] sm:$0xff] }
 0x24c   : > { %v1673_v40 = vpack.c.bf16 %v1018_v39, %v1017_v38 }
 0x24d   : > { %1610 = vmatprep.subr.bf16.mxu0 %v1609_v42  ;;  %1638 = vmatprep.subr.bf16.mxu1 %v1637_v43 }
 0x24e   : > { %1612 = vmatpush3.bf16.msra.mxu0 %v1609_v42  ;;  %1640 = vmatpush3.bf16.msra.mxu1 %v1637_v43  ;;  %v644_v44 = vld [vmem:[#allocation2 + $0xf0] sm:$0xff]  ;;  %v1020_v42 = vld [vmem:[#allocation10 + $0x68] sm:$0xff] }
 0x24f   : > { %1646 = vmatprep.subr.bf16.mxu0 %v2291_v17  ;;  %v1677_v43 = vpack.c.bf16 %v1020_v42, %v1019_v41 }
 0x251   : > { %1428 = vmatmul.mubr.f32.vlgmr.msra.gmra.mrb[0].mxu0 %v2295_v23 }
 0x252   : > { %1648 = vmatpush3.bf16.msra.mxu0 %v2291_v17  ;;  %v645_v45 = vld [vmem:[#allocation2 + $0xf8] sm:$0xff] }
 0x253   : > { %1650 = vmatprep.subr.bf16.mxu0 %v2293_v22  ;;  %v1641_v46 = vpack.c.bf16 %v645_v45, %v644_v44  ;;  %v1021_v44 = vld [vmem:[#allocation10 + $0x70] sm:$0xff]  ;;  %v1022_v45 = vld [vmem:[#allocation10 + $0x78] sm:$0xff] }
 0x255   : > { %1642 = vmatprep.subr.bf16.mxu1 %v1641_v46 }
 0x256   : > { %1644 = vmatpush3.bf16.msra.mxu1 %v1641_v46  ;;  %v1681_v46 = vpack.c.bf16 %v1022_v45, %v1021_v44 }
 0x259   : > { %1463 = vmatmul.mubr.f32.vlgmr.msra.gmra.mrb[12].mxu1 %v2297_v25 }
 0x324   : > { %v1429_v47 = vpop.f32.mrb[0].mxu0 }
 0x325   : > { %v712_v48 = vpop.f32.mrb[1].mxu0  ;;  %v800_v49 = vsel %vm439_vm0, %v1429_v47, -inf }
 0x326   : > { %801 = vmax.xlane.f32.xlu1 %v800_v49  ;;  %v797_v50 = vsel %vm439_vm0, %v712_v48, -inf }
 0x327   : > { %798 = vmax.xlane.f32.xlu0 %v797_v50 }
 0x32c   : > { %v1464_v23 = vpop.f32.mrb[12].mxu1 }
 0x32d   : > { %v787_v51 = vpop.f32.mrb[13].mxu1  ;;  %v806_v52 = vsel %vm439_vm0, %v1464_v23, -inf }
 0x32e   : > { %v803_v17 = vsel %vm439_vm0, %v787_v51, -inf }
 0x32f   : > { %804 = vmax.xlane.f32.xlu1 %v803_v17 }
 0x333   : > { %807 = vmax.xlane.f32.xlu1 %v806_v52 }
 0x3b3   : > { %v802_v53 = vpop.xlane.xlu1 %801 }
 0x3b4   : > { %v810_v54 = vsub.f32 %v1429_v47, %v802_v53  ;;  %v799_v55 = vpop.xlane.xlu0 %798 }
 0x3b5   : > { %v809_v25 = vsub.f32 %v712_v48, %v799_v55 }
 0x3b6   : > { %v815_v56 = vmul.f32 1.442695, %v810_v54 }
 0x3b7   : > { %v813_v57 = vmul.f32 1.442695, %v809_v25 }
 0x3b8   : > { %1785 = vpow2.f32 %v815_v56 }
 0x3b9   : > { %1787 = vpow2.f32 %v813_v57 }
 0x3bc   : > { %v805_v58 = vpop.xlane.xlu1 %804 }
 0x3bd   : > { %v811_v59 = vsub.f32 %v787_v51, %v805_v58 }
 0x3bf   : > { %v817_v60 = vmul.f32 1.442695, %v811_v59 }
 0x3c0   : > { %v808_v61 = vpop.xlane.xlu1 %807 }
 0x3c1   : > { %1789 = vpow2.f32 %v817_v60  ;;  %v812_v62 = vsub.f32 %v1464_v23, %v808_v61 }
 0x3c2   : > { %v1786_v63 = vpop.eup %1785 }
 0x3c3   : > { %v1788_v1 = vpop.eup %1787  ;;  %v819_v2 = vmul.f32 1.442695, %v812_v62  ;;  %v824_v3 = vsel %vm439_vm0, %v1786_v63, 0.0 }
 0x3c4   : > { %825 = vadd.xlane.f32.xlu1 %v824_v3  ;;  %v821_v4 = vsel %vm439_vm0, %v1788_v1, 0.0 }
 0x3c5   : > { %1791 = vpow2.f32 %v819_v2  ;;  %822 = vadd.xlane.f32.xlu0 %v821_v4 }
 0x3cb   : > { %v1790_v5 = vpop.eup %1789 }
 0x3cc   : > { %v827_v6 = vsel %vm439_vm0, %v1790_v5, 0.0 }
 0x3cd   : > { %828 = vadd.xlane.f32.xlu0 %v827_v6 }
 0x3cf   : > { %v1792_v7 = vpop.eup %1791 }
 0x3d0   : > { %v830_v8 = vsel %vm439_vm0, %v1792_v7, 0.0 }
 0x3d1   : > { %831 = vadd.xlane.f32.xlu1 %v830_v8 }
 0x451   : > { %v826_v9 = vpop.xlane.xlu1 %825 }
 0x452   : > { %1793 = vrcp.f32 %v826_v9  ;;  %v823_v10 = vpop.xlane.xlu0 %822 }
 0x453   : > { %1795 = vrcp.f32 %v823_v10 }
 0x45a   : > { %v829_v11 = vpop.xlane.xlu0 %828 }
 0x45b   : > { %1797 = vrcp.f32 %v829_v11 }
 0x45c   : > { %v1794_v12 = vpop.eup %1793 }
 0x45d   : > { %v1796_v14 = vpop.eup %1795  ;;  %v838_v18 = vmul.f32 %v1794_v12, %v1786_v63 }
 0x45e   : > { %v832_v15 = vpop.xlane.xlu1 %831  ;;  %v837_v16 = vmul.f32 %v1796_v14, %v1788_v1 }
 0x45f   : > { %1799 = vrcp.f32 %v832_v15 }
 0x460   : > { %1469 = vmatprep.mubr.msk.f32.mxu0 %vm439_vm0, %v837_v16 }
 0x461   : > { %1470 = vmatmul.mubr.msk.f32.vlgmr.msra.gmra.mrb[2].mxu0 %vm439_vm0, %v838_v18 }
 0x462   : > { %1652 = vmatpush3.bf16.msra.mxu0 %v2293_v22  ;;  %v1665_v22 = vpack.c.bf16 %v1014_v34, %v1013_v33 }
 0x463   : > { %1654 = vmatprep.subr.bf16.mxu0 %v1653_v19 }
 0x465   : > { %v1798_v20 = vpop.eup %1797 }
 0x466   : > { %v839_v21 = vmul.f32 %v1798_v20, %v1790_v5 }
 0x468   : > { %1476 = vmatprep.mubr.msk.f32.mxu0 %vm439_vm0, %v839_v21 }
 0x469   : > { %v1800_v27 = vpop.eup %1799 }
 0x46a   : > { %v840_v28 = vmul.f32 %v1800_v27, %v1792_v7 }
 0x46c   : > { %1477 = vmatmul.mubr.msk.f32.vlgmr.msra.gmra.mrb[4].mxu0 %vm439_vm0, %v840_v28 }
 0x46d   : > { %1656 = vmatpush3.bf16.msra.mxu0 %v1653_v19 }
 0x46e   : > { %1658 = vmatprep.subr.bf16.mxu0 %v1657_v29 }
 0x471   : > { %1660 = vmatpush3.bf16.msra.mxu0 %v1657_v29 }
 0x472   : > { %1662 = vmatprep.subr.bf16.mxu0 %v1661_v32 }
 0x475   : > { %1664 = vmatpush3.bf16.msra.mxu0 %v1661_v32 }
 0x476   : > { %1666 = vmatprep.subr.bf16.mxu0 %v1665_v22 }
 0x479   : > { %1668 = vmatpush3.bf16.msra.mxu0 %v1665_v22 }
 0x47a   : > { %1670 = vmatprep.subr.bf16.mxu0 %v1669_v37 }
 0x47d   : > { %1672 = vmatpush3.bf16.msra.mxu0 %v1669_v37 }
 0x47e   : > { %1674 = vmatprep.subr.bf16.mxu0 %v1673_v40 }
 0x481   : > { %1676 = vmatpush3.bf16.msra.mxu0 %v1673_v40 }
 0x482   : > { %1678 = vmatprep.subr.bf16.mxu0 %v1677_v43 }
 0x485   : > { %1680 = vmatpush3.bf16.msra.mxu0 %v1677_v43 }
 0x486   : > { %1682 = vmatprep.subr.bf16.mxu0 %v1681_v46 }
 0x489   : > { %1684 = vmatpush3.bf16.msra.mxu0 %v1681_v46 }
 0x534   : > { %v1471_v47 = vpop.f32.mrb[2].mxu0 }
 0x535   : > { %v917_v48 = vpop.f32.mrb[3].mxu0 }
 0x536   : > { %1511 = vmatprep.mubr.f32.mxu0 %v917_v48 }
 0x537   : > { %1512 = vmatmul.mubr.f32.vlgmr.msra.gmra.mrb[6].mxu0 %v1471_v47 }
 0x53f   : > { %v1478_v49 = vpop.f32.mrb[4].mxu0 }
 0x540   : > { %v998_v50 = vpop.f32.mrb[5].mxu0 }
 0x541   : > { %1514 = vmatprep.mubr.f32.mxu0 %v998_v50 }
 0x542   : > { %1515 = vmatmul.mubr.f32.gmra.mrb[8].mxu0 %v1478_v49 }
 0x60a   : > { %v1513_v23 = vpop.f32.mrb[6].mxu0 }
 0x60b   : > { %1109 = vst [vmem:[%s274_s23 + $0x8] sm:$0xff] %v1513_v23  ;;  %v1089_v51 = vpop.f32.mrb[7].mxu0 }
 0x60c   : > { %1108 = vst [vmem:[%s274_s23] sm:$0xff] %v1089_v51 }
 0x615   : > { %v1516_v17 = vpop.f32.mrb[8].mxu0 }
 0x616   : > { %1111 = vst [vmem:[%s274_s23 + $0x18] sm:$0xff] %v1516_v17  ;;  %v1099_v52 = vpop.f32.mrb[9].mxu0 }
 0x617   : > { %1110 = vst [vmem:[%s274_s23 + $0x10] sm:$0xff] %v1099_v52 }
 0x618   : > { %1928 = shalt.err (!%p1925_p0)
}
 0x619   : > { %s1929_s24 = scalar_lea.hbm %s2357_s6, 512  ;;  %s1933_s7 = scalar_lea.hbm %s2410_s4, 1024 }
 0x61a   : > { %p1930_p4 = scmp.ne.s32.totalorder %s2357_s6, %s1929_s24  ;;  %p1934_p12 = scmp.lt.u32.totalorder %s2357_s6, %s2410_s4 }
 0x61b   : > { %p1935_p1 = scmp.lt.u32.totalorder %s1933_s7, %s1929_s24  ;;  %p1937_p13 = scmp.lt.u32.totalorder %s1929_s24, %s2357_s6 }
 0x61c   : > { %p1931_p2 = pnand %p1930_p4, %p2204_p3 }
 0x61d   : > { %p1936_p7 = por %p1935_p1, %p1934_p12 }
 0x61e   : > { %p1932_p8 = pneg %p1931_p2 }
 0x61f   : > { %p1938_p6 = por %p1937_p13, %p1936_p7 }
 0x621   : > { %p1939_p10 = pnand %p1938_p6, %p1932_p8 }
 0x623   : > { %1942 = shalt.err (!%p1939_p10)
}
 0x624   : > { %s2017_s23 = smov 128   ;;  %s2018_s27 = smov 8  }
 0x625   : > { %1699 = dma.vmem_to_hbm [thread:$0]  (%p2204_p3), %s2352_s25, 512, %s2357_s6, %s1113_s1, %s2017_s23, %s2017_s23, %s2018_s27  }
 0x626 PF: > { %s1144_s22 = sand.u32 1, %s1985_s15   ;;  %p2437_p11 = scmp.ne.s32.totalorder %s2423_s26, 0 }
 0x627   : > { %p2438_p5 = scmp.ge.s32.totalorder %s2005_s20, 2  ;;  %s1145_s5 = scalar_lea.sflag [#allocation6], %s1144_s22 }
 0x629   : > { %p1716_p9 = pnand %p2438_p5, %p2437_p11 }
 0x62b   : > { %1980 = dma.done.wait (!%p1716_p9), %s1145_s5, 512  }
 0x62c   : > { %1982 = vsyncadd (!%p1716_p9), %s1145_s5, 4294966784  ;;  %s22_s20 = sadd.s32 1, %s2005_s20   ;;  %s2439_s15 = smov %s1989_s16 }
 0x62d   : > { %p19_p0 = scmp.ge.s32.totalorder %s22_s20, 4   ;;  %s2440_s16 = smov %s1993_s17 }
 0x62e   : > { %s2441_s17 = smov %s2213_s13  ;;  %s2442_s18 = smov %s2001_s19 }
 0x62f   : > { %s2443_s19 = smov %s2445_s12  ;;  %21 = sbr.rel (!%p19_p0) target bundleno = 10 (0xa), region = 98 }
 0x636   :  { %1150 = vsyncpa [#allocation5], 1 }
 0x637   :  { %1152 = vsyncpa [#allocation5 + $0x1], 1 }
 0x638   :  { %1153 = vsyncpa [#allocation8], 1 }
 0x639   :  { %1154 = vsyncpa [#allocation11], 1 }
 0x63a   :  { %1155 = vsyncpa [#allocation6], 1 }
 0x63b   :  { %1157 = vsyncpa [#allocation6 + $0x1], 1 }

</bundles_post_ra>
